<compile_context>
chip_gen: v6e
topology: v6e:2x2x1
jax: 0.10.0
libtpu: 0.0.40
codegen_flags: <defaults>
</compile_context>

<pallas_src>
import functools
import math

import jax
import jax.numpy as jnp
from jax import lax
from jax.experimental import pallas as pl
from jax.experimental.pallas import tpu as pltpu

LANES = 128
SUBLANES = 8
CHUNK_ROWS = 128                     # rows folded per inner-loop iteration (bounds vregs)
TARGET_BLOCK_BYTES = 2 << 20         # ~2 MiB per streamed input block
RESIDENT_LIMIT_BYTES = 2 << 20       # max D_out slab kept resident for the fused path
VMEM_LIMIT_BYTES = 32 * 1024 * 1024  # explicit budget, safe on v5e/v6e/v7x
BCE_PAD = 60.0                       # softplus(-60) == 0 to f32 precision (neutral pad)


# ------------------------------ device helpers ------------------------------ #

@functools.lru_cache(maxsize=1)
def _num_cores():
    """TensorCores per device: 2 on v4/v5p/v7x, 1 on v2/v3/v5e/v6e."""
    try:
        kind = jax.devices()[0].device_kind.lower()
    except Exception:
        return 1
    return 2 if any(tag in kind for tag in ("v7", "7x", "v4", "v5p", "v5 p")) else 1


def _round_up(x, m):
    return ((x + m - 1) // m) * m


def _row_align(dtype):
    """Sublane alignment for the slab dtype: 8 f32, 16 bf16, 32 int8/fp8."""
    itemsize = jnp.dtype(dtype).itemsize
    return SUBLANES * max(1, 4 // itemsize)


# ------------------------------ slab building -------------------------------- #

def _to_slab(x, pad_value, row_multiple=1):
    """Flatten to a (rows, 128) lane-major slab in the ORIGINAL dtype.

    Pads at most row_multiple*128 - 1 elements with a loss-neutral value; when the
    element count already lines up this is a pure (zero-copy) reshape.  Block tails
    beyond the slab's rows are masked inside the kernel, so no large pad is needed.
    """
    flat = x.reshape(-1)
    n = flat.shape[0]
    chunk = row_multiple * LANES
    pad = (-n) % chunk
    if pad:
        flat = jnp.pad(flat, (0, pad), constant_values=pad_value)
    return flat.reshape(-1, LANES)


def _choose_block_rows(r_slab, slabs, ncores):
    align = max(_row_align(s.dtype) for s in slabs)
    itemsize = max(jnp.dtype(s.dtype).itemsize for s in slabs)
    cap = max(CHUNK_ROWS, TARGET_BLOCK_BYTES // (LANES * itemsize))  # multiple of 128
    per_core = pl.cdiv(r_slab, ncores)
    if per_core <= CHUNK_ROWS:
        return _round_up(per_core, align)
    return min(cap, _round_up(per_core, CHUNK_ROWS))


# ------------------------------ fold functions ------------------------------- #

def _l1_fold(chunks, rows_left):
    """(chunk_rows,128) |a-b| folded to (8,128) f32 with pure VPU adds."""
    a = chunks[0].astype(jnp.float32)
    b = chunks[1].astype(jnp.float32)
    d = jnp.abs(a - b)
    if rows_left is not None:
        rows = lax.broadcasted_iota(jnp.int32, d.shape, 0)
        d = jnp.where(rows < rows_left, d, 0.0)
    return jnp.sum(d.reshape(-1, SUBLANES, LANES), axis=0)


def _bce_fold(chunks, rows_left):
    """(chunk_rows,128) softplus(-x) (= BCEWithLogits vs ones) folded to (8,128)."""
    x = chunks[0].astype(jnp.float32)
    loss = jnp.maximum(x, 0.0) - x + jnp.log1p(jnp.exp(-jnp.abs(x)))
    if rows_left is not None:
        rows = lax.broadcasted_iota(jnp.int32, loss.shape, 0)
        loss = jnp.where(rows < rows_left, loss, 0.0)
    return jnp.sum(loss.reshape(-1, SUBLANES, LANES), axis=0)


# --------------------------- generic streaming call --------------------------- #

def _partial_sums(stream_slabs, fold, resident_slab=None, resident_fold=None):
    """Streaming (rows,128)-slab reduction -> per-core (8,128) f32 partial sums.

    Optionally folds a small `resident_slab` (kept in VMEM for the whole call) once
    on (core 0, step 0) into a second partial-sum output (fused BCE path).
    """
    r_slab = stream_slabs[0].shape[0]
    for sl in stream_slabs[1:]:
        assert sl.shape == stream_slabs[0].shape

    ncores = _num_cores()
    block_rows = _choose_block_rows(r_slab, stream_slabs, ncores)
    chunk_rows = min(CHUNK_ROWS, block_rows)
    n_sub = block_rows // chunk_rows
    unroll_n = math.gcd(n_sub, 8)
    nblocks = pl.cdiv(r_slab, block_rows)
    steps = pl.cdiv(nblocks, ncores)
    last_block = nblocks - 1
    needs_mask = (ncores * steps * block_rows) != r_slab
    has_resident = resident_slab is not None
    n_stream = len(stream_slabs)

    if has_resident:
        res_rows = resident_slab.shape[0]
        res_chunk = min(CHUNK_ROWS, res_rows)
        n_res_sub = res_rows // res_chunk
        res_unroll = math.gcd(n_res_sub, 8)

    def stream_index_map(c, s):
        # Clamp so a fully out-of-range step (odd block count split over 2 cores)
        # still issues an in-bounds DMA; its contribution is masked to zero.
        return (jnp.minimum(c * steps + s, last_block), 0)

    def out_index_map(c, s):
        return (c, 0)

    def kernel(*refs):
        stream_refs = refs[:n_stream]
        if has_resident:
            res_ref = refs[n_stream]
            out_ref = refs[n_stream + 1]
            res_out_ref = refs[n_stream + 2]
        else:
            out_ref = refs[n_stream]

        c = pl.program_id(0)
        s = pl.program_id(1)
        zeros = jnp.zeros((SUBLANES, LANES), jnp.float32)

        @pl.when(s == 0)
        def _init():
            out_ref[...] = jnp.zeros_like(out_ref)
            if has_resident:
                res_out_ref[...] = jnp.zeros_like(res_out_ref)

        if has_resident:
            # Tiny resident slab (PatchGAN logits) folded exactly once, chunked.
            @pl.when((s == 0) & (c == 0))
            def _resident():
                def body(i, acc):
                    row0 = pl.multiple_of(i * res_chunk, res_chunk)
                    return acc + resident_fold([res_ref[pl.ds(row0, res_chunk), :]], None)
                res_out_ref[...] += lax.fori_loop(0, n_res_sub, body, zeros,
                                                  unroll=res_unroll)

        def fold_block(rows_left_fn):
            def body(i, acc):
                row0 = pl.multiple_of(i * chunk_rows, chunk_rows)
                chunks = [r[pl.ds(row0, chunk_rows), :] for r in stream_refs]
                return acc + fold(chunks, rows_left_fn(row0))
            return lax.fori_loop(0, n_sub, body, zeros, unroll=unroll_n)

        if needs_mask:
            block_row0 = (c * steps + s) * block_rows  # logical first row of block

            @pl.when(block_row0 + block_rows <= r_slab)
            def _full_block():
                out_ref[...] += fold_block(lambda row0: None)

            @pl.when(block_row0 + block_rows > r_slab)
            def _tail_block():
                out_ref[...] += fold_block(lambda row0: r_slab - (block_row0 + row0))
        else:
            out_ref[...] += fold_block(lambda row0: None)

    in_specs = [pl.BlockSpec((block_rows, LANES), stream_index_map)
                for _ in stream_slabs]
    operands = list(stream_slabs)
    out_shapes = [jax.ShapeDtypeStruct((ncores * SUBLANES, LANES), jnp.float32)]
    out_specs = [pl.BlockSpec((SUBLANES, LANES), out_index_map)]
    if has_resident:
        in_specs.append(pl.BlockSpec(resident_slab.shape, lambda c, s: (0, 0)))
        operands.append(resident_slab)
        out_shapes.append(jax.ShapeDtypeStruct((ncores * SUBLANES, LANES), jnp.float32))
        out_specs.append(pl.BlockSpec((SUBLANES, LANES), out_index_map))

    res = pl.pallas_call(
        kernel,
        out_shape=tuple(out_shapes),
        grid=(ncores, steps),
        in_specs=in_specs,
        out_specs=tuple(out_specs),
        compiler_params=pltpu.CompilerParams(
            dimension_semantics=("parallel", "arbitrary"),
            vmem_limit_bytes=VMEM_LIMIT_BYTES),
    )(*operands)
    return tuple(res) if isinstance(res, (list, tuple)) else (res,)


# ------------------------------- loss wrappers -------------------------------- #

def gen_loss_terms(G_out, target_image, D_out):
    """adv = mean(softplus(-D_out)), recon = mean(|G_out - target|), one fused call."""
    if target_image.size != G_out.size:
        raise ValueError("L1 operands must have the same number of elements")
    n_l1 = G_out.size
    n_bce = D_out.size

    g_slab = _to_slab(G_out, 0.0)
    t_slab = _to_slab(target_image, 0.0)

    d_align = _row_align(D_out.dtype)
    d_rows_est = _round_up(max(1, pl.cdiv(n_bce, LANES)), d_align)
    d_bytes = d_rows_est * LANES * jnp.dtype(D_out.dtype).itemsize

    if d_bytes <= RESIDENT_LIMIT_BYTES:
        # Fused path: D_out slab is resident in VMEM; one pallas_call computes both sums.
        row_mult = d_align if d_rows_est <= CHUNK_ROWS else CHUNK_ROWS
        d_slab = _to_slab(D_out, BCE_PAD, row_multiple=row_mult)
        l1_part, bce_part = _partial_sums([g_slab, t_slab], _l1_fold,
                                          resident_slab=d_slab,
                                          resident_fold=_bce_fold)
    else:
        # Rare: huge discriminator output -> stream it through its own reduction call.
        (l1_part,) = _partial_sums([g_slab, t_slab], _l1_fold)
        (bce_part,) = _partial_sums([_to_slab(D_out, BCE_PAD)], _bce_fold)

    # Tiny per-core (8,128) partials -> scalars (plain JAX epilogue).
    recon_loss = jnp.sum(l1_part) / jnp.float32(n_l1)
    adv_loss = jnp.sum(bce_part) / jnp.float32(n_bce)
    return adv_loss, recon_loss


class GenLoss:
    """JAX/Pallas port of the PyTorch GenLoss module."""

    def __init__(self, lambda_reg):
        self.lambda_reg = float(lambda_reg)

    def __call__(self, input, gen, disc, target_image):
        G_out = gen(input)                     # glue: generator forward (plain JAX)
        D_out = disc(G_out, input)             # glue: discriminator forward (plain JAX)
        adv_loss, recon_loss = gen_loss_terms(G_out, target_image, D_out)
        combined_loss = adv_loss + jnp.float32(self.lambda_reg) * recon_loss
        self.adv_loss = adv_loss               # mirror the PyTorch attribute
        return combined_loss, adv_loss, recon_loss


# ------------------ deterministic synthetic gen / disc ------------------------ #
# GenLoss itself has no weights; gen/disc are forward-time arguments.  Tiny
# deterministic 1x1-conv networks give the loss kernel realistic inputs.

def make_gen(key, c_in, c_out):
    w = 0.1 * jax.random.normal(key, (c_out, c_in), jnp.float32)

    def gen(x):  # (B, C_in, H, W) NCHW -> (B, C_out, H, W)
        return jnp.tanh(jnp.einsum("oc,bchw->bohw", w, x))

    return gen


def make_disc(key, c_g, c_in):
    w = 0.1 * jax.random.normal(key, (1, c_g + c_in), jnp.float32)

    def disc(g_out, x):  # PatchGAN-style logits map (B, 1, H, W)
        cat = jnp.concatenate([g_out, x], axis=1)
        return jnp.einsum("oc,bchw->bohw", w, cat)

    return disc


# ----------------------------------- main -------------------------------------- #

if __name__ == "__main__":
    key = jax.random.PRNGKey(0)
    k_in, k_tgt, k_gen, k_disc = jax.random.split(key, 4)

    B, C, H, W = 2, 4, 16, 16
    x = jax.random.normal(k_in, (B, C, H, W), jnp.float32)
    target = jax.random.normal(k_tgt, (B, C, H, W), jnp.float32)

    gen = make_gen(k_gen, C, C)
    disc = make_disc(k_disc, C, C)

    loss_mod = GenLoss(lambda_reg=100.0)
    combined, adv, recon = loss_mod(x, gen, disc, target)
    jax.block_until_ready((combined, adv, recon))

    # quiet pure-JAX reference check
    G_out = gen(x)
    D_out = disc(G_out, x)
    adv_ref = jnp.mean(jnp.maximum(D_out, 0.0) - D_out + jnp.log1p(jnp.exp(-jnp.abs(D_out))))
    recon_ref = jnp.mean(jnp.abs(G_out - target))
    comb_ref = adv_ref + 100.0 * recon_ref
    assert jnp.allclose(adv, adv_ref, rtol=1e-5, atol=1e-5)
    assert jnp.allclose(recon, recon_ref, rtol=1e-5, atol=1e-5)
    assert jnp.allclose(combined, comb_ref, rtol=1e-5, atol=1e-5)

    print("KERNEL_OK")
</pallas_src>

<mosaic_0001>
module attributes {stable_mosaic.version = 11 : i64} {
  func.func @kernel(%arg0: i32, %arg1: i32, %arg2: memref<16x128xf32, #tpu.memory_space<vmem>>, %arg3: memref<16x128xf32, #tpu.memory_space<vmem>>, %arg4: memref<8x128xf32, #tpu.memory_space<vmem>>, %arg5: memref<8x128xf32, #tpu.memory_space<vmem>>, %arg6: memref<8x128xf32, #tpu.memory_space<vmem>>) attributes {dimension_semantics = [#tpu.dimension_semantics<parallel>, #tpu.dimension_semantics<arbitrary>], iteration_bounds = array<i64: 1, 1>, scalar_prefetch = 0 : i64, scratch_operands = 0 : i64, tpu.core_type = #tpu.core_type<tc>, window_params = [{transform_indices = @transform_0, window_bounds = array<i64: 16, 128>}, {transform_indices = @transform_1, window_bounds = array<i64: 16, 128>}, {pipeline_mode = #tpu.pipeline_mode<synchronous>, transform_indices = @transform_2, window_bounds = array<i64: 8, 128>}, {transform_indices = @transform_3, window_bounds = array<i64: 8, 128>}, {transform_indices = @transform_4, window_bounds = array<i64: 8, 128>}]} {
    %cst = arith.constant 0.000000e+00 : f32
    %0 = vector.broadcast %cst : f32 to vector<8x128xf32>
    %c0_i32 = arith.constant 0 : i32
    %1 = arith.cmpi eq, %arg1, %c0_i32 : i32
    %2 = arith.extui %1 : i1 to i32
    %c0_i32_0 = arith.constant 0 : i32
    %3 = arith.cmpi ne, %2, %c0_i32_0 : i32
    scf.if %3 {
      %cst_11 = arith.constant 0.000000e+00 : f32
      %23 = vector.broadcast %cst_11 : f32 to vector<8x128xf32>
      %c0_12 = arith.constant 0 : index
      %c0_13 = arith.constant 0 : index
      %24 = vector.load %arg5[%c0_12, %c0_13] : memref<8x128xf32, #tpu.memory_space<vmem>>, vector<8x128xf32>
      tpu.vector_store %arg5[%c0_12, %c0_13], %23 {strides = array<i32>} : memref<8x128xf32, #tpu.memory_space<vmem>>, vector<8x128xf32>,
      %cst_14 = arith.constant 0.000000e+00 : f32
      %25 = vector.broadcast %cst_14 : f32 to vector<8x128xf32>
      %c0_15 = arith.constant 0 : index
      %c0_16 = arith.constant 0 : index
      %26 = vector.load %arg6[%c0_15, %c0_16] : memref<8x128xf32, #tpu.memory_space<vmem>>, vector<8x128xf32>
      tpu.vector_store %arg6[%c0_15, %c0_16], %25 {strides = array<i32>} : memref<8x128xf32, #tpu.memory_space<vmem>>, vector<8x128xf32>,
    } else {
    }
    %c0_i32_1 = arith.constant 0 : i32
    %4 = arith.cmpi eq, %arg1, %c0_i32_1 : i32
    %c0_i32_2 = arith.constant 0 : i32
    %5 = arith.cmpi eq, %arg0, %c0_i32_2 : i32
    %6 = arith.andi %4, %5 : i1
    %7 = arith.extui %6 : i1 to i32
    %c0_i32_3 = arith.constant 0 : i32
    %8 = arith.cmpi ne, %7, %c0_i32_3 : i32
    scf.if %8 {
      %c0_11 = arith.constant 0 : index
      %c0_12 = arith.constant 0 : index
      %23 = vector.load %arg6[%c0_11, %c0_12] : memref<8x128xf32, #tpu.memory_space<vmem>>, vector<8x128xf32>
      %c0_i32_13 = arith.constant 0 : i32
      %c8_i32 = arith.constant 8 : i32
      %24 = arith.muli %c0_i32_13, %c8_i32 : i32
      %25 = tpu.assume_multiple %24, 8 : i32
      %26 = arith.index_cast %25 : i32 to index
      %c0_14 = arith.constant 0 : index
      %27 = vector.load %arg4[%26, %c0_14] : memref<8x128xf32, #tpu.memory_space<vmem>>, vector<8x128xf32>
      %cst_15 = arith.constant 0.000000e+00 : f32
      %28 = vector.broadcast %cst_15 : f32 to vector<8x128xf32>
      %29 = arith.maximumf %27, %28 : vector<8x128xf32>
      %30 = arith.subf %29, %27 : vector<8x128xf32>
      %31 = math.absf %27 : vector<8x128xf32>
      %cst_16 = arith.constant 0.000000e+00 : f32
      %32 = vector.broadcast %cst_16 : f32 to vector<8x128xf32>
      %33 = arith.subf %32, %31 : vector<8x128xf32>
      %34 = math.exp %33 : vector<8x128xf32>
      %35 = math.log1p %34 : vector<8x128xf32>
      %36 = arith.addf %30, %35 : vector<8x128xf32>
      %37 = vector.shape_cast %36 : vector<8x128xf32> to vector<1x8x128xf32>
      %cst_17 = arith.constant dense<0.000000e+00> : vector<8x128xf32>
      %38 = vector.multi_reduction <add>, %37, %cst_17 [0] : vector<1x8x128xf32> to vector<8x128xf32>
      %39 = arith.addf %0, %38 : vector<8x128xf32>
      %c1_i32_18 = arith.constant 1 : i32
      %40 = arith.addf %23, %39 : vector<8x128xf32>
      %c0_19 = arith.constant 0 : index
      %c0_20 = arith.constant 0 : index
      %41 = vector.load %arg6[%c0_19, %c0_20] : memref<8x128xf32, #tpu.memory_space<vmem>>, vector<8x128xf32>
      tpu.vector_store %arg6[%c0_19, %c0_20], %40 {strides = array<i32>} : memref<8x128xf32, #tpu.memory_space<vmem>>, vector<8x128xf32>,
    } else {
    }
    %c0 = arith.constant 0 : index
    %c0_4 = arith.constant 0 : index
    %9 = vector.load %arg5[%c0, %c0_4] : memref<8x128xf32, #tpu.memory_space<vmem>>, vector<8x128xf32>
    %c0_i32_5 = arith.constant 0 : i32
    %c16_i32 = arith.constant 16 : i32
    %10 = arith.muli %c0_i32_5, %c16_i32 : i32
    %11 = tpu.assume_multiple %10, 16 : i32
    %12 = arith.index_cast %11 : i32 to index
    %c0_6 = arith.constant 0 : index
    %13 = vector.load %arg2[%12, %c0_6] : memref<16x128xf32, #tpu.memory_space<vmem>>, vector<16x128xf32>
    %14 = arith.index_cast %11 : i32 to index
    %c0_7 = arith.constant 0 : index
    %15 = vector.load %arg3[%14, %c0_7] : memref<16x128xf32, #tpu.memory_space<vmem>>, vector<16x128xf32>
    %16 = arith.subf %13, %15 : vector<16x128xf32>
    %17 = math.absf %16 : vector<16x128xf32>
    %18 = vector.shape_cast %17 : vector<16x128xf32> to vector<2x8x128xf32>
    %cst_8 = arith.constant dense<0.000000e+00> : vector<8x128xf32>
    %19 = vector.multi_reduction <add>, %18, %cst_8 [0] : vector<2x8x128xf32> to vector<8x128xf32>
    %20 = arith.addf %0, %19 : vector<8x128xf32>
    %c1_i32 = arith.constant 1 : i32
    %21 = arith.addf %9, %20 : vector<8x128xf32>
    %c0_9 = arith.constant 0 : index
    %c0_10 = arith.constant 0 : index
    %22 = vector.load %arg5[%c0_9, %c0_10] : memref<8x128xf32, #tpu.memory_space<vmem>>, vector<8x128xf32>
    tpu.vector_store %arg5[%c0_9, %c0_10], %21 {strides = array<i32>} : memref<8x128xf32, #tpu.memory_space<vmem>>, vector<8x128xf32>,
    return
  }
  func.func @transform_0(%arg0: i32, %arg1: i32) -> (i32, i32) {
    %c1_i32 = arith.constant 1 : i32
    %0 = arith.muli %arg0, %c1_i32 : i32
    %1 = arith.addi %0, %arg1 : i32
    %c0_i32 = arith.constant 0 : i32
    %2 = arith.minsi %1, %c0_i32 : i32
    %c0_i32_0 = arith.constant 0 : i32
    %c0_i32_1 = arith.constant 0 : i32
    return %2, %c0_i32_0 : i32, i32
  }
  func.func @transform_1(%arg0: i32, %arg1: i32) -> (i32, i32) {
    %c1_i32 = arith.constant 1 : i32
    %0 = arith.muli %arg0, %c1_i32 : i32
    %1 = arith.addi %0, %arg1 : i32
    %c0_i32 = arith.constant 0 : i32
    %2 = arith.minsi %1, %c0_i32 : i32
    %c0_i32_0 = arith.constant 0 : i32
    %c0_i32_1 = arith.constant 0 : i32
    return %2, %c0_i32_0 : i32, i32
  }
  func.func @transform_2(%arg0: i32, %arg1: i32) -> (i32, i32) {
    %c0_i32 = arith.constant 0 : i32
    %c0_i32_0 = arith.constant 0 : i32
    %c0_i32_1 = arith.constant 0 : i32
    return %c0_i32, %c0_i32_0 : i32, i32
  }
  func.func @transform_3(%arg0: i32, %arg1: i32) -> (i32, i32) {
    %c0_i32 = arith.constant 0 : i32
    %c0_i32_0 = arith.constant 0 : i32
    return %arg0, %c0_i32 : i32, i32
  }
  func.func @transform_4(%arg0: i32, %arg1: i32) -> (i32, i32) {
    %c0_i32 = arith.constant 0 : i32
    %c0_i32_0 = arith.constant 0 : i32
    return %arg0, %c0_i32 : i32, i32
  }
}

</mosaic_0001>

<bundles_post_ra>
// kernel: tpu_custom_call.1
= control target key start
LH: loop header
LB: loop body
LE: loop exit
PB: predicated region body
PF: predicated region fallthrough
CT: control target
= control target key end

     0   :  { %10 = vsyncpa [#allocation3], 0  ;;  %s324_s0 = inlined_call_operand.hbm [shape: f32[16,128], index: 0, kind: input, shape index: {}]   ;;  %s325_s1 = inlined_call_operand.hbm [shape: f32[16,128], index: 1, kind: input, shape index: {}]   ;;  %s326_s2 = inlined_call_operand.hbm [shape: f32[8,128], index: 2, kind: input, shape index: {}]   ;;  %s327_s3 = inlined_call_operand.hbm [shape: f32[8,128], index: 3, kind: output, shape index: {0}]   ;;  %s328_s4 = inlined_call_operand.hbm [shape: f32[8,128], index: 4, kind: output, shape index: {1}]  }
   0x1   :  { %11 = vsyncpa [#allocation6], 0 }
   0x2   :  { %12 = vsyncpa [#allocation4], 0 }
   0x3   :  { %13 = vsyncpa [#allocation10], 0  ;;  %s277_s15 = smov [#allocation5]   ;;  %s278_s17 = smov [#allocation2]  }
   0x4   :  { %s43_s16 = sshll.u32 %s277_s15, 4  ;;  %s25_s18 = sshll.u32 %s278_s17, 4  ;;  %s44_s16 = int_to_ptr.vmem [resolvable:$true] %s43_s16  ;;  %s26_s18 = int_to_ptr.vmem [resolvable:$true] %s25_s18 }
   0x5   :  { %s177_s19 = scalar_lea.vmem %s44_s16, 256  ;;  %p182_p1 = scmp.lt.s32.totalorder %s44_s16, %s44_s16 }
   0x6   :  { %p178_p0 = scmp.ne.s32.totalorder %s44_s16, %s177_s19  ;;  %p183_p2 = scmp.lt.s32.totalorder %s177_s19, %s177_s19 }
   0x8   :  { %p184_p3 = por %p183_p2, %p182_p1 }
   0xa   :  { %p185_p4 = pnand %p184_p3, %p178_p0 }
   0xc   :  { %188 = shalt.err (!%p185_p4)
}
   0xd   :  { %s279_s20 = smov 128   ;;  %s280_s21 = smov 8  }
   0xe   :  { %49 = dma.hbm_to_vmem [thread:$0]  %s325_s1, 256, %s44_s16, [#allocation6], %s279_s20, %s279_s20, %s280_s21  }
   0xf   :  { %s197_s24 = scalar_lea.vmem %s26_s18, 256  ;;  %p202_p6 = scmp.lt.s32.totalorder %s26_s18, %s26_s18 }
  0x10   :  { %p198_p5 = scmp.ne.s32.totalorder %s26_s18, %s197_s24  ;;  %p203_p7 = scmp.lt.s32.totalorder %s197_s24, %s197_s24 }
  0x12   :  { %p204_p8 = por %p203_p7, %p202_p6 }
  0x14   :  { %p205_p9 = pnand %p204_p8, %p198_p5 }
  0x16   :  { %208 = shalt.err (!%p205_p9)
}
  0x17   :  { %31 = dma.hbm_to_vmem [thread:$0]  %s324_s0, 256, %s26_s18, [#allocation3], %s279_s20, %s279_s20, %s280_s21  }
  0x18   :  { %s281_s27 = smov [#allocation7]  }
  0x19   :  { %s56_s28 = sshll.u32 %s281_s27, 4  ;;  %s57_s28 = int_to_ptr.vmem [resolvable:$true] %s56_s28 }
  0x1a   :  { %s217_s29 = scalar_lea.vmem %s57_s28, 128  ;;  %p222_p11 = scmp.lt.s32.totalorder %s57_s28, %s57_s28 }
  0x1b   :  { %p218_p10 = scmp.ne.s32.totalorder %s57_s28, %s217_s29  ;;  %p223_p12 = scmp.lt.s32.totalorder %s217_s29, %s217_s29 }
  0x1d   :  { %p224_p13 = por %p223_p12, %p222_p11 }
  0x1f   :  { %p225_p0 = pnand %p224_p13, %p218_p10 }
  0x21   :  { %228 = shalt.err (!%p225_p0)
}
  0x22   :  { %59 = dma.hbm_to_vmem [thread:$0]  %s326_s2, 128, %s57_s28, [#allocation6]  }
  0x23   :  { %269 = dma.done.wait [#allocation3], 256  }
  0x24   :  { %270 = vsyncadd [#allocation3], 4294967040 }
  0x25   :  { %271 = dma.done.wait [#allocation6], 384  }
  0x26   :  { %272 = vsyncadd [#allocation6], 4294966912  ;;  %v89_v0 = vld [vmem:[#allocation7] sm:$0xff]  ;;  %v112_v2 = vld [vmem:[#allocation2 + $0x8] sm:$0xff]  ;;  %s282_s0 = smov [#allocation8]  }
  0x27   :  { %v111_v1 = vld [vmem:[#allocation2] sm:$0xff]  ;;  %v92_v3 = vand.u32 2147483647, %v89_v0  ;;  %v113_v4 = vld [vmem:[#allocation5] sm:$0xff]  ;;  %v114_v5 = vld [vmem:[#allocation5 + $0x8] sm:$0xff]  ;;  %s129_s5 = sshll.u32 %s282_s0, 4  ;;  %s130_s5 = int_to_ptr.vmem [resolvable:$true] %s129_s5 }
  0x28   :  { %v115_v6 = vsub.f32 %v111_v1, %v113_v4  ;;  %v116_v7 = vsub.f32 %v112_v2, %v114_v5  ;;  %s229_s2 = scalar_lea.vmem %s130_s5, 128  ;;  %p234_p2 = scmp.lt.s32.totalorder %s130_s5, %s130_s5 }
  0x29   :  { %v93_v8 = vsub.f32 0.0, %v92_v3  ;;  %p230_p1 = scmp.ne.s32.totalorder %s130_s5, %s229_s2  ;;  %p235_p3 = scmp.lt.s32.totalorder %s229_s2, %s229_s2 }
  0x2a   :  { %v117_v9 = vand.u32 2147483647, %v115_v6  ;;  %v118_v10 = vand.u32 2147483647, %v116_v7 }
  0x2b   :  { %v94_v11 = vmul.f32 1.442695, %v93_v8  ;;  %p236_p4 = por %p235_p3, %p234_p2 }
  0x2c   :  { %v119_v12 = vadd.f32 %v118_v10, %v117_v9 }
  0x2d   :  { %165 = vpow2.f32 %v94_v11  ;;  %p237_p5 = pnand %p236_p4, %p230_p1 }
  0x2e   :  { %122 = vst [vmem:[#allocation8] sm:$0xff] %v119_v12 }
  0x2f   :  { %240 = shalt.err (!%p237_p5)
}
  0x30   :  { %132 = dma.vmem_to_hbm [thread:$0]  %s130_s5, 128, %s327_s3, [#allocation4]   ;;  %v90_v17 = vmax.f32 %v89_v0, 0.0 }
  0x31   :  { %s283_s8 = smov [#allocation9]  }
  0x32   :  { %v91_v21 = vsub.f32 %v90_v17, %v89_v0  ;;  %s139_s9 = sshll.u32 %s283_s8, 4  ;;  %s140_s9 = int_to_ptr.vmem [resolvable:$true] %s139_s9 }
  0x33   :  { %s249_s10 = scalar_lea.vmem %s140_s9, 128  ;;  %p254_p7 = scmp.lt.s32.totalorder %s140_s9, %s140_s9 }
  0x34   :  { %p250_p6 = scmp.ne.s32.totalorder %s140_s9, %s249_s10  ;;  %p255_p8 = scmp.lt.s32.totalorder %s249_s10, %s249_s10 }
  0x36   :  { %p256_p9 = por %p255_p8, %p254_p7 }
  0x38   :  { %p257_p10 = pnand %p256_p9, %p250_p6 }
  0x3a   :  { %v166_v13 = vpop.eup %165 }
  0x3b   :  { %v96_v14 = vadd.f32 1.0, %v166_v13  ;;  %v99_v15 = vmul.f32 -0.5, %v166_v13  ;;  %v102_v18 = vand.u32 2147483647, %v166_v13 }
  0x3d   :  { %167 = vlog2.f32 %v96_v14  ;;  %v100_v16 = vadd.f32 1.0, %v99_v15  ;;  %vm103_vm0 = vcmp.lt.f32.partialorder %v102_v18, 0.0004427343 }
  0x3f   :  { %v101_v19 = vmul.f32 %v166_v13, %v100_v16 }
  0x4a   :  { %v168_v20 = vpop.eup %167 }
  0x4b   :  { %v98_v22 = vmul.f32 0.6931472, %v168_v20 }
  0x4d   :  { %v104_v23 = vsel %vm103_vm0, %v101_v19, %v98_v22 }
  0x4e   :  { %v105_v24 = vadd.f32 %v104_v23, %v91_v21 }
  0x50   :  { %109 = vst [vmem:[#allocation9] sm:$0xff] %v105_v24 }
  0x51   :  { %260 = shalt.err (!%p257_p10)
}
  0x52   :  { %142 = dma.vmem_to_hbm [thread:$0]  %s140_s9, 128, %s328_s4, [#allocation10]  }
  0x53   :  { %273 = dma.done.wait [#allocation4], 128  }
  0x54   :  { %274 = vsyncadd [#allocation4], 4294967168 }
  0x55   :  { %275 = dma.done.wait [#allocation10], 128  }
  0x56   :  { %276 = vsyncadd [#allocation10], 4294967168 }
  0x57   :  { %149 = vsyncpa [#allocation3], 1 }
  0x58   :  { %150 = vsyncpa [#allocation6], 1 }
  0x59   :  { %151 = vsyncpa [#allocation4], 1 }
  0x5a   :  { %152 = vsyncpa [#allocation10], 1 }

</bundles_post_ra>
